<compile_context>
chip_gen: v6e
topology: v6e:2x2x1
jax: 0.10.0
libtpu: 0.0.40
codegen_flags: <defaults>
</compile_context>

<pallas_src>
import functools

import jax
import jax.numpy as jnp
from jax.experimental import pallas as pl
from jax.experimental.pallas import tpu as pltpu

EPS = 1e-5


# ----------------------------------------------------------------------------
# helpers
# ----------------------------------------------------------------------------
def _round_up(x, m):
    return ((x + m - 1) // m) * m


def _cdiv(a, b):
    return -(-a // b)


def _vmem_capacity_bytes():
    """Physical VMEM capacity (per TensorCore); conservative fallback = 64 MiB."""
    try:
        info = pltpu.get_tpu_info()
        cap = int(getattr(info, "vmem_capacity_bytes", 0) or 0)
        if cap > 0:
            return cap
    except Exception:
        pass
    return 64 * 1024 * 1024  # v7x-safe default


def _maybe_pad(a, r_pad, s_pad):
    r, s = a.shape
    if (r_pad, s_pad) == (r, s):
        return a
    return jnp.pad(a, ((0, r_pad - r), (0, s_pad - s)))


# ----------------------------------------------------------------------------
# fast path: whole (padded) spatial extent in one block per row tile
# ----------------------------------------------------------------------------
def _instance_norm_kernel(x_ref, s_ref, xo_ref, so_ref, *, inv_n):
    # One-pass moments (sum / sum-of-squares), divide by the TRUE spatial size
    # so zero padding along the lane axis contributes nothing.
    def _norm(v):
        v = v.astype(jnp.float32)
        mean = jnp.sum(v, axis=-1, keepdims=True) * inv_n
        msq = jnp.sum(v * v, axis=-1, keepdims=True) * inv_n
        var = jnp.maximum(msq - mean * mean, 0.0)  # biased variance
        return (v - mean) * jax.lax.rsqrt(var + EPS)

    xo_ref[...] = _norm(x_ref[...]).astype(xo_ref.dtype)
    so_ref[...] = _norm(s_ref[...]).astype(so_ref.dtype)


def _instance_norm_fast(x2d, s2d, *, tm, s_true, vmem_limit):
    R_pad, S_pad = x2d.shape
    inv_n = 1.0 / float(s_true)
    spec = pl.BlockSpec((tm, S_pad), lambda i: (i, 0))
    out_sds = jax.ShapeDtypeStruct((R_pad, S_pad), x2d.dtype)
    return pl.pallas_call(
        functools.partial(_instance_norm_kernel, inv_n=inv_n),
        out_shape=(out_sds, out_sds),
        grid_spec=pltpu.PrefetchScalarGridSpec(
            num_scalar_prefetch=0,
            grid=(R_pad // tm,),
            in_specs=[spec, spec],
            out_specs=[spec, spec],
        ),
        compiler_params=pltpu.CompilerParams(
            dimension_semantics=("parallel",),
            vmem_limit_bytes=vmem_limit,
        ),
    )(x2d, s2d)


# ----------------------------------------------------------------------------
# chunked path (very large D*H*W): pass 1 = per-row moments over S chunks,
# pass 2 = normalize. Stats accumulate directly in the resident output blocks.
# ----------------------------------------------------------------------------
def _stats_kernel(x_ref, s_ref, xm_ref, xr_ref, sm_ref, sr_ref, *, inv_n):
    j = pl.program_id(1)

    @pl.when(j == 0)
    def _():
        xm_ref[...] = jnp.zeros_like(xm_ref)
        xr_ref[...] = jnp.zeros_like(xr_ref)
        sm_ref[...] = jnp.zeros_like(sm_ref)
        sr_ref[...] = jnp.zeros_like(sr_ref)

    xv = x_ref[...].astype(jnp.float32)
    sv = s_ref[...].astype(jnp.float32)
    xm_ref[...] += jnp.sum(xv, axis=-1, keepdims=True)        # running sum
    xr_ref[...] += jnp.sum(xv * xv, axis=-1, keepdims=True)   # running sumsq
    sm_ref[...] += jnp.sum(sv, axis=-1, keepdims=True)
    sr_ref[...] += jnp.sum(sv * sv, axis=-1, keepdims=True)

    @pl.when(j == pl.num_programs(1) - 1)
    def _():
        xm = xm_ref[...] * inv_n
        xvar = jnp.maximum(xr_ref[...] * inv_n - xm * xm, 0.0)
        xm_ref[...] = xm
        xr_ref[...] = jax.lax.rsqrt(xvar + EPS)
        sm = sm_ref[...] * inv_n
        svar = jnp.maximum(sr_ref[...] * inv_n - sm * sm, 0.0)
        sm_ref[...] = sm
        sr_ref[...] = jax.lax.rsqrt(svar + EPS)


def _apply_kernel(xm_ref, xr_ref, sm_ref, sr_ref, x_ref, s_ref, xo_ref, so_ref):
    xo_ref[...] = ((x_ref[...].astype(jnp.float32) - xm_ref[...])
                   * xr_ref[...]).astype(xo_ref.dtype)
    so_ref[...] = ((s_ref[...].astype(jnp.float32) - sm_ref[...])
                   * sr_ref[...]).astype(so_ref.dtype)


def _instance_norm_chunked(x2d, s2d, *, tm, ts, s_true, vmem_limit):
    R_pad, S_pad = x2d.shape
    n_i, n_j = R_pad // tm, S_pad // ts
    inv_n = 1.0 / float(s_true)

    data_spec = pl.BlockSpec((tm, ts), lambda i, j: (i, j))
    stat_spec = pl.BlockSpec((tm, 1), lambda i, j: (i, 0))
    stat_sds = jax.ShapeDtypeStruct((R_pad, 1), jnp.float32)

    # Pass 1: moments (S-chunk axis is the reduction -> "arbitrary", innermost).
    xm, xr, sm, sr = pl.pallas_call(
        functools.partial(_stats_kernel, inv_n=inv_n),
        out_shape=(stat_sds, stat_sds, stat_sds, stat_sds),
        grid_spec=pltpu.PrefetchScalarGridSpec(
            num_scalar_prefetch=0,
            grid=(n_i, n_j),
            in_specs=[data_spec, data_spec],
            out_specs=[stat_spec, stat_spec, stat_spec, stat_spec],
        ),
        compiler_params=pltpu.CompilerParams(
            dimension_semantics=("parallel", "arbitrary"),
            vmem_limit_bytes=vmem_limit,
        ),
    )(x2d, s2d)

    # Pass 2: normalize (fully parallel grid).
    out_sds = jax.ShapeDtypeStruct((R_pad, S_pad), x2d.dtype)
    return pl.pallas_call(
        _apply_kernel,
        out_shape=(out_sds, out_sds),
        grid_spec=pltpu.PrefetchScalarGridSpec(
            num_scalar_prefetch=0,
            grid=(n_i, n_j),
            in_specs=[stat_spec, stat_spec, stat_spec, stat_spec,
                      data_spec, data_spec],
            out_specs=[data_spec, data_spec],
        ),
        compiler_params=pltpu.CompilerParams(
            dimension_semantics=("parallel", "parallel"),
            vmem_limit_bytes=vmem_limit,
        ),
    )(xm, xr, sm, sr, x2d, s2d)


# ----------------------------------------------------------------------------
# wrapper
# ----------------------------------------------------------------------------
def instance_norm3d_pair(x, skip, *, vmem_budget_bytes=None, force_chunked=False):
    """InstanceNorm3d (no affine, eps=1e-5) applied to x and skip, fused."""
    assert x.shape == skip.shape, "x and skip must have matching shapes"
    assert x.ndim == 5, "expected (N, C, D, H, W) inputs"
    N, C, D, H, W = x.shape
    R = N * C
    S = D * H * W

    x2d = x.reshape(R, S)
    s2d = skip.reshape(R, S)

    itemsize = jnp.dtype(x.dtype).itemsize
    sublane = {4: 8, 2: 16, 1: 32}.get(itemsize, 8)
    # 2 inputs + 2 outputs, each double-buffered, + ~4 f32 temporaries per elem.
    per_elem = 8 * itemsize + 16

    cap = _vmem_capacity_bytes()
    budget = int(vmem_budget_bytes) if vmem_budget_bytes is not None else cap // 2
    vmem_limit = min(cap * 3 // 4, 112 * 1024 * 1024)

    # Lane-dense last dim: pad flattened spatial axis to a multiple of 128 when
    # it is large and misaligned (zero padding is exact: moments divide by S).
    S_lane = _round_up(S, 128) if S >= 128 else S
    per_row_fast = S_lane * per_elem

    use_fast = (not force_chunked) and (per_row_fast * sublane <= budget)

    if use_fast:
        S_pad = S_lane
        tm_cap = max(sublane, (budget // per_row_fast) // sublane * sublane)
        R_ceil = _round_up(R, sublane)
        # Aim for >= ~8 grid steps when rows allow (pipelining + megacore on v7x),
        # but never exceed the VMEM budget.
        tm_steps = _round_up(_cdiv(R_ceil, 8), sublane)
        tm = min(tm_cap, tm_steps, R_ceil)
        R_pad = _round_up(R, tm)
        x2d = _maybe_pad(x2d, R_pad, S_pad)
        s2d = _maybe_pad(s2d, R_pad, S_pad)
        xo, so = _instance_norm_fast(x2d, s2d, tm=tm, s_true=S,
                                     vmem_limit=vmem_limit)
    else:
        # Full-row block would not fit VMEM: chunk the spatial axis on the grid.
        ts = min(_round_up(S, 128),
                 max(128, (budget // (sublane * per_elem)) // 128 * 128))
        S_pad = _round_up(S, ts)
        tm = max(sublane, (budget // (ts * per_elem)) // sublane * sublane)
        R_ceil = _round_up(R, sublane)
        tm = min(tm, R_ceil)
        R_pad = _round_up(R, tm)
        x2d = _maybe_pad(x2d, R_pad, S_pad)
        s2d = _maybe_pad(s2d, R_pad, S_pad)
        xo, so = _instance_norm_chunked(x2d, s2d, tm=tm, ts=ts, s_true=S,
                                        vmem_limit=vmem_limit)

    if (R_pad, S_pad) != (R, S):
        xo = xo[:R, :S]
        so = so[:R, :S]
    return xo.reshape(x.shape), so.reshape(x.shape)


class CrossAggregationModule:
    """JAX/Pallas port of the PyTorch CrossAggregationModule.

    InstanceNorm3d with default args has no learnable parameters, so there is
    nothing to initialize beyond eps (deterministic by construction).
    """

    def __init__(self, embed_dims=None, use_residual=True, ffn_cfg=None,
                 num_heads=8, bias=False):
        self.embed_dims = embed_dims

    def forward(self, x, skip):
        # TODO(synk): original forward returns None; we expose (x_norm, skip_norm).
        return instance_norm3d_pair(x, skip)


def _reference_instance_norm3d(v, eps=EPS):
    v = v.astype(jnp.float32)
    mean = jnp.mean(v, axis=(2, 3, 4), keepdims=True)
    var = jnp.mean((v - mean) ** 2, axis=(2, 3, 4), keepdims=True)
    return (v - mean) / jnp.sqrt(var + eps)


if __name__ == "__main__":
    key = jax.random.PRNGKey(0)
    k1, k2, k3, k4 = jax.random.split(key, 4)

    # Test 1: aligned shapes -> fast (full-row-block) path.
    N, C, D, H, W = 2, 4, 4, 8, 8
    x = jax.random.normal(k1, (N, C, D, H, W), dtype=jnp.float32)
    skip = jax.random.normal(k2, (N, C, D, H, W), dtype=jnp.float32)

    mod = CrossAggregationModule(embed_dims=C)
    x_norm, skip_norm = mod.forward(x, skip)
    jax.block_until_ready(x_norm)
    jax.block_until_ready(skip_norm)
    assert jnp.allclose(x_norm, _reference_instance_norm3d(x), atol=1e-3, rtol=1e-3)
    assert jnp.allclose(skip_norm, _reference_instance_norm3d(skip), atol=1e-3, rtol=1e-3)

    # Test 2: misaligned shapes (R % 8 != 0, S % 128 != 0) -> padding path.
    N2, C2, D2, H2, W2 = 1, 3, 3, 7, 9
    x2 = jax.random.normal(k3, (N2, C2, D2, H2, W2), dtype=jnp.float32)
    s2 = jax.random.normal(k4, (N2, C2, D2, H2, W2), dtype=jnp.float32)
    xn2, sn2 = instance_norm3d_pair(x2, s2)
    jax.block_until_ready(xn2)
    assert jnp.allclose(xn2, _reference_instance_norm3d(x2), atol=1e-3, rtol=1e-3)
    assert jnp.allclose(sn2, _reference_instance_norm3d(s2), atol=1e-3, rtol=1e-3)

    # Test 3: force the S-chunked (large-volume) two-pass path with a tiny budget.
    xn3, sn3 = instance_norm3d_pair(x, skip, vmem_budget_bytes=64 * 1024,
                                    force_chunked=True)
    jax.block_until_ready(xn3)
    assert jnp.allclose(xn3, _reference_instance_norm3d(x), atol=1e-3, rtol=1e-3)
    assert jnp.allclose(sn3, _reference_instance_norm3d(skip), atol=1e-3, rtol=1e-3)

    print("KERNEL_OK")
</pallas_src>

<mosaic_0001>
module attributes {stable_mosaic.version = 11 : i64} {
  func.func @_instance_norm_kernel(%arg0: i32, %arg1: memref<8x256xf32, #tpu.memory_space<vmem>>, %arg2: memref<8x256xf32, #tpu.memory_space<vmem>>, %arg3: memref<8x256xf32, #tpu.memory_space<vmem>>, %arg4: memref<8x256xf32, #tpu.memory_space<vmem>>) attributes {dimension_semantics = [#tpu.dimension_semantics<parallel>], iteration_bounds = array<i64: 1>, scalar_prefetch = 0 : i64, scratch_operands = 0 : i64, tpu.core_type = #tpu.core_type<tc>, window_params = [{transform_indices = @transform_0, window_bounds = array<i64: 8, 256>}, {transform_indices = @transform_1, window_bounds = array<i64: 8, 256>}, {transform_indices = @transform_2, window_bounds = array<i64: 8, 256>}, {transform_indices = @transform_3, window_bounds = array<i64: 8, 256>}]} {
    %c0 = arith.constant 0 : index
    %c0_0 = arith.constant 0 : index
    %0 = vector.load %arg1[%c0, %c0_0] : memref<8x256xf32, #tpu.memory_space<vmem>>, vector<8x256xf32>
    %cst = arith.constant dense<0.000000e+00> : vector<8xf32>
    %1 = vector.multi_reduction <add>, %0, %cst [1] : vector<8x256xf32> to vector<8xf32>
    %2 = vector.shape_cast %1 : vector<8xf32> to vector<8x1xf32>
    %cst_1 = arith.constant 3.906250e-03 : f32
    %3 = vector.broadcast %cst_1 : f32 to vector<8x1xf32>
    %4 = arith.mulf %2, %3 : vector<8x1xf32>
    %5 = arith.mulf %0, %0 : vector<8x256xf32>
    %cst_2 = arith.constant dense<0.000000e+00> : vector<8xf32>
    %6 = vector.multi_reduction <add>, %5, %cst_2 [1] : vector<8x256xf32> to vector<8xf32>
    %7 = vector.shape_cast %6 : vector<8xf32> to vector<8x1xf32>
    %cst_3 = arith.constant 3.906250e-03 : f32
    %8 = vector.broadcast %cst_3 : f32 to vector<8x1xf32>
    %9 = arith.mulf %7, %8 : vector<8x1xf32>
    %10 = arith.mulf %4, %4 : vector<8x1xf32>
    %11 = arith.subf %9, %10 : vector<8x1xf32>
    %cst_4 = arith.constant 0.000000e+00 : f32
    %12 = vector.broadcast %cst_4 : f32 to vector<8x1xf32>
    %13 = arith.maximumf %11, %12 : vector<8x1xf32>
    %14 = vector.broadcast %4 : vector<8x1xf32> to vector<8x256xf32>
    %15 = arith.subf %0, %14 : vector<8x256xf32>
    %cst_5 = arith.constant 9.99999974E-6 : f32
    %16 = vector.broadcast %cst_5 : f32 to vector<8x1xf32>
    %17 = arith.addf %13, %16 : vector<8x1xf32>
    %18 = math.rsqrt %17 : vector<8x1xf32>
    %19 = vector.broadcast %18 : vector<8x1xf32> to vector<8x256xf32>
    %20 = arith.mulf %15, %19 : vector<8x256xf32>
    %c0_6 = arith.constant 0 : index
    %c0_7 = arith.constant 0 : index
    %21 = vector.load %arg3[%c0_6, %c0_7] : memref<8x256xf32, #tpu.memory_space<vmem>>, vector<8x256xf32>
    tpu.vector_store %arg3[%c0_6, %c0_7], %20 {strides = array<i32>} : memref<8x256xf32, #tpu.memory_space<vmem>>, vector<8x256xf32>,
    %c0_8 = arith.constant 0 : index
    %c0_9 = arith.constant 0 : index
    %22 = vector.load %arg2[%c0_8, %c0_9] : memref<8x256xf32, #tpu.memory_space<vmem>>, vector<8x256xf32>
    %cst_10 = arith.constant dense<0.000000e+00> : vector<8xf32>
    %23 = vector.multi_reduction <add>, %22, %cst_10 [1] : vector<8x256xf32> to vector<8xf32>
    %24 = vector.shape_cast %23 : vector<8xf32> to vector<8x1xf32>
    %cst_11 = arith.constant 3.906250e-03 : f32
    %25 = vector.broadcast %cst_11 : f32 to vector<8x1xf32>
    %26 = arith.mulf %24, %25 : vector<8x1xf32>
    %27 = arith.mulf %22, %22 : vector<8x256xf32>
    %cst_12 = arith.constant dense<0.000000e+00> : vector<8xf32>
    %28 = vector.multi_reduction <add>, %27, %cst_12 [1] : vector<8x256xf32> to vector<8xf32>
    %29 = vector.shape_cast %28 : vector<8xf32> to vector<8x1xf32>
    %cst_13 = arith.constant 3.906250e-03 : f32
    %30 = vector.broadcast %cst_13 : f32 to vector<8x1xf32>
    %31 = arith.mulf %29, %30 : vector<8x1xf32>
    %32 = arith.mulf %26, %26 : vector<8x1xf32>
    %33 = arith.subf %31, %32 : vector<8x1xf32>
    %cst_14 = arith.constant 0.000000e+00 : f32
    %34 = vector.broadcast %cst_14 : f32 to vector<8x1xf32>
    %35 = arith.maximumf %33, %34 : vector<8x1xf32>
    %36 = vector.broadcast %26 : vector<8x1xf32> to vector<8x256xf32>
    %37 = arith.subf %22, %36 : vector<8x256xf32>
    %cst_15 = arith.constant 9.99999974E-6 : f32
    %38 = vector.broadcast %cst_15 : f32 to vector<8x1xf32>
    %39 = arith.addf %35, %38 : vector<8x1xf32>
    %40 = math.rsqrt %39 : vector<8x1xf32>
    %41 = vector.broadcast %40 : vector<8x1xf32> to vector<8x256xf32>
    %42 = arith.mulf %37, %41 : vector<8x256xf32>
    %c0_16 = arith.constant 0 : index
    %c0_17 = arith.constant 0 : index
    %43 = vector.load %arg4[%c0_16, %c0_17] : memref<8x256xf32, #tpu.memory_space<vmem>>, vector<8x256xf32>
    tpu.vector_store %arg4[%c0_16, %c0_17], %42 {strides = array<i32>} : memref<8x256xf32, #tpu.memory_space<vmem>>, vector<8x256xf32>,
    return
  }
  func.func @transform_0(%arg0: i32) -> (i32, i32) {
    %c0_i32 = arith.constant 0 : i32
    %c0_i32_0 = arith.constant 0 : i32
    return %arg0, %c0_i32 : i32, i32
  }
  func.func @transform_1(%arg0: i32) -> (i32, i32) {
    %c0_i32 = arith.constant 0 : i32
    %c0_i32_0 = arith.constant 0 : i32
    return %arg0, %c0_i32 : i32, i32
  }
  func.func @transform_2(%arg0: i32) -> (i32, i32) {
    %c0_i32 = arith.constant 0 : i32
    %c0_i32_0 = arith.constant 0 : i32
    return %arg0, %c0_i32 : i32, i32
  }
  func.func @transform_3(%arg0: i32) -> (i32, i32) {
    %c0_i32 = arith.constant 0 : i32
    %c0_i32_0 = arith.constant 0 : i32
    return %arg0, %c0_i32 : i32, i32
  }
}

</mosaic_0001>

<bundles_post_ra>
// kernel: tpu_custom_call.1
= control target key start
LH: loop header
LB: loop body
LE: loop exit
PB: predicated region body
PF: predicated region fallthrough
CT: control target
= control target key end

     0   :  { %9 = vsyncpa [#allocation3], 0  ;;  %s247_s0 = inlined_call_operand.hbm [shape: f32[8,256], index: 0, kind: input, shape index: {}]   ;;  %s248_s1 = inlined_call_operand.hbm [shape: f32[8,256], index: 1, kind: input, shape index: {}]   ;;  %s249_s2 = inlined_call_operand.hbm [shape: f32[8,256], index: 2, kind: output, shape index: {0}]   ;;  %s250_s3 = inlined_call_operand.hbm [shape: f32[8,256], index: 3, kind: output, shape index: {1}]  }
   0x1   :  { %10 = vsyncpa [#allocation6], 0 }
   0x2   :  { %11 = vsyncpa [#allocation4], 0 }
   0x3   :  { %12 = vsyncpa [#allocation9], 0  ;;  %s211_s12 = smov [#allocation2]   ;;  %s212_s14 = smov [#allocation5]  }
   0x4   :  { %s19_s13 = sshll.u32 %s211_s12, 4  ;;  %s29_s15 = sshll.u32 %s212_s14, 4  ;;  %s20_s13 = int_to_ptr.vmem [resolvable:$true] %s19_s13  ;;  %s30_s15 = int_to_ptr.vmem [resolvable:$true] %s29_s15 }
   0x5   :  { %s131_s16 = scalar_lea.vmem %s20_s13, 256  ;;  %p136_p1 = scmp.lt.s32.totalorder %s20_s13, %s20_s13 }
   0x6   :  { %p132_p0 = scmp.ne.s32.totalorder %s20_s13, %s131_s16  ;;  %p137_p2 = scmp.lt.s32.totalorder %s131_s16, %s131_s16 }
   0x8   :  { %p138_p3 = por %p137_p2, %p136_p1 }
   0xa   :  { %p139_p4 = pnand %p138_p3, %p132_p0 }
   0xc   :  { %142 = shalt.err (!%p139_p4)
}
   0xd   :  { %22 = dma.hbm_to_vmem [thread:$0]  %s247_s0, 256, %s20_s13, [#allocation3]  }
   0xe   :  { %s151_s19 = scalar_lea.vmem %s30_s15, 256  ;;  %p156_p6 = scmp.lt.s32.totalorder %s30_s15, %s30_s15 }
   0xf   :  { %p152_p5 = scmp.ne.s32.totalorder %s30_s15, %s151_s19  ;;  %p157_p7 = scmp.lt.s32.totalorder %s151_s19, %s151_s19 }
  0x11   :  { %p158_p8 = por %p157_p7, %p156_p6 }
  0x13   :  { %p159_p9 = pnand %p158_p8, %p152_p5 }
  0x15   :  { %162 = shalt.err (!%p159_p9)
}
  0x16   :  { %32 = dma.hbm_to_vmem [thread:$0]  %s248_s1, 256, %s30_s15, [#allocation6]  }
  0x17   :  { %203 = dma.done.wait [#allocation3], 256  }
  0x18   :  { %204 = vsyncadd [#allocation3], 4294967040 }
  0x19   :  { %205 = dma.done.wait [#allocation6], 256  }
  0x1a   :  { %206 = vsyncadd [#allocation6], 4294967040  ;;  %v39_v0 = vld [vmem:[#allocation2] sm:$0xff]  ;;  %v40_v1 = vld [vmem:[#allocation2 + $0x8] sm:$0xff]  ;;  %s213_s0 = smov [#allocation7]   ;;  %s214_s22 = smov [#allocation8]  }
  0x1b   :  { %v62_v2 = vld [vmem:[#allocation5] sm:$0xff]  ;;  %v41_v3 = vadd.f32 %v40_v1, %v39_v0  ;;  %v45_v4 = vmul.f32 %v39_v0, %v39_v0  ;;  %v46_v5 = vmul.f32 %v40_v1, %v40_v1  ;;  %v63_v6 = vld [vmem:[#allocation5 + $0x8] sm:$0xff]  ;;  %s91_s1 = sshll.u32 %s213_s0, 4  ;;  %s101_s23 = sshll.u32 %s214_s22, 4  ;;  %s92_s1 = int_to_ptr.vmem [resolvable:$true] %s91_s1  ;;  %s102_s23 = int_to_ptr.vmem [resolvable:$true] %s101_s23 }
  0x1c   :  { %v68_v7 = vmul.f32 %v62_v2, %v62_v2  ;;  %v69_v8 = vmul.f32 %v63_v6, %v63_v6  ;;  %v64_v10 = vadd.f32 %v63_v6, %v62_v2  ;;  %s163_s24 = scalar_lea.vmem %s92_s1, 256  ;;  %p168_p11 = scmp.lt.s32.totalorder %s92_s1, %s92_s1 }
  0x1d   :  { %42 = vadd.xlane.f32.xlu0 %v41_v3  ;;  %v47_v9 = vadd.f32 %v46_v5, %v45_v4  ;;  %p164_p10 = scmp.ne.s32.totalorder %s92_s1, %s163_s24  ;;  %p169_p12 = scmp.lt.s32.totalorder %s163_s24, %s163_s24 }
  0x1e   :  { %v70_v11 = vadd.f32 %v69_v8, %v68_v7 }
  0x1f   :  { %48 = vadd.xlane.f32.xlu1 %v47_v9  ;;  %p170_p13 = por %p169_p12, %p168_p11 }
  0x21   :  { %65 = vadd.xlane.f32.xlu0 %v64_v10  ;;  %p171_p0 = pnand %p170_p13, %p164_p10 }
  0x23   :  { %71 = vadd.xlane.f32.xlu1 %v70_v11 }
  0xa6   :  { %v43_v12 = vpop.xlane.xlu0 %42 }
  0xa7   :  { %v44_v13 = vmul.f32 0.00390625, %v43_v12 }
  0xa8   :  { %v49_v14 = vpop.xlane.xlu1 %48 }
  0xa9   :  { %v50_v15 = vmul.f32 0.00390625, %v49_v14  ;;  %v51_v16 = vmul.f32 %v44_v13, %v44_v13  ;;  %v54_v28 = vsub.f32 %v39_v0, %v44_v13  ;;  %v55_v29 = vsub.f32 %v40_v1, %v44_v13 }
  0xaa   :  { %v66_v17 = vpop.xlane.xlu0 %65 }
  0xab   :  { %v52_v18 = vsub.f32 %v50_v15, %v51_v16  ;;  %v67_v19 = vmul.f32 0.00390625, %v66_v17 }
  0xac   :  { %v72_v20 = vpop.xlane.xlu1 %71 }
  0xad   :  { %v53_v21 = vmax.f32 %v52_v18, 0.0  ;;  %v73_v22 = vmul.f32 0.00390625, %v72_v20  ;;  %v74_v23 = vmul.f32 %v67_v19, %v67_v19  ;;  %v77_v33 = vsub.f32 %v62_v2, %v67_v19 }
  0xae   :  { %v78_v34 = vsub.f32 %v63_v6, %v67_v19 }
  0xaf   :  { %v56_v24 = vadd.f32 1e-05, %v53_v21  ;;  %v75_v25 = vsub.f32 %v73_v22, %v74_v23 }
  0xb1   :  { %119 = vrsqrt.f32 %v56_v24  ;;  %v76_v26 = vmax.f32 %v75_v25, 0.0 }
  0xb3   :  { %v79_v27 = vadd.f32 1e-05, %v76_v26 }
  0xb5   :  { %121 = vrsqrt.f32 %v79_v27 }
  0xbe   :  { %v120_v30 = vpop.eup %119 }
  0xbf   :  { %v58_v31 = vmul.f32 %v120_v30, %v54_v28  ;;  %v59_v32 = vmul.f32 %v120_v30, %v55_v29 }
  0xc1   :  { %60 = vst [vmem:[#allocation7] sm:$0xff] %v58_v31  ;;  %61 = vst [vmem:[#allocation7 + $0x8] sm:$0xff] %v59_v32 }
  0xc2   :  { %174 = shalt.err (!%p171_p0)
}
  0xc3   :  { %94 = dma.vmem_to_hbm [thread:$0]  %s92_s1, 256, %s249_s2, [#allocation4]   ;;  %v122_v35 = vpop.eup %121 }
  0xc4   :  { %v81_v36 = vmul.f32 %v122_v35, %v77_v33  ;;  %v82_v37 = vmul.f32 %v122_v35, %v78_v34  ;;  %s183_s27 = scalar_lea.vmem %s102_s23, 256  ;;  %p188_p2 = scmp.lt.s32.totalorder %s102_s23, %s102_s23 }
  0xc5   :  { %p184_p1 = scmp.ne.s32.totalorder %s102_s23, %s183_s27  ;;  %p189_p3 = scmp.lt.s32.totalorder %s183_s27, %s183_s27 }
  0xc6   :  { %83 = vst [vmem:[#allocation8] sm:$0xff] %v81_v36  ;;  %84 = vst [vmem:[#allocation8 + $0x8] sm:$0xff] %v82_v37 }
  0xc7   :  { %p190_p4 = por %p189_p3, %p188_p2 }
  0xc9   :  { %p191_p5 = pnand %p190_p4, %p184_p1 }
  0xcb   :  { %194 = shalt.err (!%p191_p5)
}
  0xcc   :  { %104 = dma.vmem_to_hbm [thread:$0]  %s102_s23, 256, %s250_s3, [#allocation9]  }
  0xcd   :  { %207 = dma.done.wait [#allocation4], 256  }
  0xce   :  { %208 = vsyncadd [#allocation4], 4294967040 }
  0xcf   :  { %209 = dma.done.wait [#allocation9], 256  }
  0xd0   :  { %210 = vsyncadd [#allocation9], 4294967040 }
  0xd1   :  { %111 = vsyncpa [#allocation3], 1 }
  0xd2   :  { %112 = vsyncpa [#allocation6], 1 }
  0xd3   :  { %113 = vsyncpa [#allocation4], 1 }
  0xd4   :  { %114 = vsyncpa [#allocation9], 1 }

</bundles_post_ra>
